<compile_context>
chip_gen: v7x
topology: tpu7x:2x2x1
jax: 0.10.0
libtpu: 0.0.40
codegen_flags: <defaults>
</compile_context>

<pallas_src>
import functools
import math

import jax
import jax.numpy as jnp
from jax.experimental import pallas as pl
from jax.experimental.pallas import tpu as pltpu


_LANE = 128


def _copy_kernel(x_ref, o_ref):
    # Aligned fast path: the input block *is* the selected window already.
    o_ref[...] = x_ref[...]


def _shift_kernel(x_ref, o_ref, *, shift, sizeout):
    # Covering-window path: the input block holds the (128-aligned) block that
    # contains [idxmin, idxmax); select the window with a static lane slice.
    o_ref[...] = x_ref[:, shift:shift + sizeout]


def _vmem_budget_bytes():
    """Per-step (double-buffered in+out) block budget, generation aware."""
    cap = 64 * 1024 * 1024  # v7x-safe fallback (smallest physical VMEM)
    try:
        cap = int(pltpu.get_tpu_info().vmem_capacity_bytes)
    except Exception:
        pass
    return max(8 << 20, min(cap // 3, 48 << 20))


def _pick_batch_tile(nb, row_bytes_2buf, sublane, budget):
    """Largest batch tile (multiple of `sublane`, or the full nb) whose
    double-buffered in+out blocks fit `budget`.  Prefers an exact divisor of
    nb (no ragged edge block); otherwise the ragged last block is handled by
    Pallas with masked edge reads/writes."""
    if nb * row_bytes_2buf <= budget:
        return nb
    rows = budget // max(row_bytes_2buf, 1)
    rows = max(sublane, (rows // sublane) * sublane)
    t = rows
    while t > sublane and nb % t:
        t -= sublane
    return t if nb % t == 0 else rows


def _maybe_split_for_megacore(tile_nb, nb, sublane, row_bytes_1buf):
    """If the whole problem would be a single grid step, split the batch axis
    in two so both TensorCores (v7x) get work -- but only when each block
    stays >= ~1 MiB, so tiny problems keep a single cheap step."""
    if tile_nb < nb or nb < 2 * sublane:
        return tile_nb
    half = -(-nb // 2)                       # ceil(nb / 2)
    half = -(-half // sublane) * sublane     # round up to sublane
    if half >= nb or half * row_bytes_1buf < (1 << 20):
        return tile_nb
    return half


def selector_patch_1d(x, idxmin, idxmax):
    """Pallas implementation of SelectorPatch1d.forward.

    Args:
      x: array of shape (Nb, sizein).
      idxmin, idxmax: static Python ints defining the selected window.

    Returns:
      array of shape (Nb, idxmax - idxmin), same dtype as x.
    """
    nb, sizein = x.shape
    sizeout = idxmax - idxmin
    assert 0 <= idxmin <= idxmax <= sizein
    if sizeout == 0:
        return jnp.zeros((nb, 0), dtype=x.dtype)

    itemsize = jnp.dtype(x.dtype).itemsize
    sublane = 8 * max(1, 4 // itemsize)      # 8 for f32, 16 bf16, 32 int8
    budget = _vmem_budget_bytes()

    aligned = (idxmin % _LANE == 0) and (sizeout % _LANE == 0)

    if aligned:
        # Window-only DMA: feature tile divides both the window size and its
        # offset, so the index_map points straight at the selected columns and
        # unselected columns never leave HBM.
        g = math.gcd(idxmin, sizeout) if idxmin else sizeout
        ft = next((c for c in (4096, 2048, 1024, 512, 384, 256, 128)
                   if g % c == 0), _LANE)
        row_bytes_2buf = 2 * 2 * ft * itemsize
        tile_nb = _pick_batch_tile(nb, row_bytes_2buf, sublane, budget)
        if sizeout // ft == 1:
            tile_nb = _maybe_split_for_megacore(
                tile_nb=tile_nb, nb=nb, sublane=sublane,
                row_bytes_1buf=2 * ft * itemsize)
        q0 = idxmin // ft
        grid = (pl.cdiv(nb, tile_nb), sizeout // ft)
        in_specs = [pl.BlockSpec((tile_nb, ft), lambda i, j: (i, q0 + j))]
        out_specs = pl.BlockSpec((tile_nb, ft), lambda i, j: (i, j))
        kernel = _copy_kernel
        dims = ("parallel", "parallel")
        read_cols = sizeout
        block_bytes = tile_nb * row_bytes_2buf
    else:
        # Unaligned window: fetch only the smallest 128*2^k-aligned feature
        # block covering [idxmin, idxmax); fall back to the full row only if
        # the window straddles every such boundary. Lane-shift in VMEM.
        fb = _LANE
        while fb < sizein and (idxmin // fb) != ((idxmax - 1) // fb):
            fb *= 2
        if fb >= sizein:
            fb, q, shift = sizein, 0, idxmin
        else:
            q = idxmin // fb
            shift = idxmin - q * fb
        row_bytes_2buf = 2 * (fb + sizeout) * itemsize
        tile_nb = _pick_batch_tile(nb, row_bytes_2buf, sublane, budget)
        tile_nb = _maybe_split_for_megacore(
            tile_nb=tile_nb, nb=nb, sublane=sublane,
            row_bytes_1buf=(fb + sizeout) * itemsize)
        grid = (pl.cdiv(nb, tile_nb),)
        in_specs = [pl.BlockSpec((tile_nb, fb), lambda i: (i, q))]
        out_specs = pl.BlockSpec((tile_nb, sizeout), lambda i: (i, 0))
        kernel = functools.partial(_shift_kernel, shift=shift, sizeout=sizeout)
        dims = ("parallel",)
        read_cols = fb
        block_bytes = tile_nb * row_bytes_2buf

    vmem_limit = int(max(32 << 20, block_bytes + (4 << 20)))
    cost = pl.CostEstimate(
        flops=0, transcendentals=0,
        bytes_accessed=int(nb * (read_cols + sizeout) * itemsize))

    return pl.pallas_call(
        kernel,
        out_shape=jax.ShapeDtypeStruct((nb, sizeout), x.dtype),
        grid=grid,
        in_specs=in_specs,
        out_specs=out_specs,
        compiler_params=pltpu.CompilerParams(
            dimension_semantics=dims,
            vmem_limit_bytes=vmem_limit,
        ),
        cost_estimate=cost,
    )(x)


# TODO(synk): applyJacobianT (complex64 zero-padded adjoint) is not part of the
# forward pass; it would be a second kernel that zero-fills an (Nb, sizein)
# output and writes the window in the same kernel (single HBM pass).


if __name__ == "__main__":
    key = jax.random.PRNGKey(0)
    k1, k2, k3, k4, k5 = jax.random.split(key, 5)

    # Case 1: module-sized small shape (unaligned window), batch=2.
    #   SelectorPatch1d(sz=32, idxmin=8, idxmax=24) -> sizeout = 16
    x1 = jax.random.normal(k1, (2, 32), dtype=jnp.float32)
    y1 = jax.block_until_ready(selector_patch_1d(x1, 8, 24))
    assert y1.shape == (2, 16)
    assert jnp.array_equal(y1, x1[:, 8:24]), "mismatch (unaligned small)"

    # Case 2: 128-aligned window -> window-only DMA fast path.
    x2 = jax.random.normal(k2, (64, 512), dtype=jnp.float32)
    y2 = jax.block_until_ready(selector_patch_1d(x2, 128, 384))
    assert y2.shape == (64, 256)
    assert jnp.array_equal(y2, x2[:, 128:384]), "mismatch (aligned)"

    # Case 3: unaligned window, covering block == full row.
    x3 = jax.random.normal(k3, (32, 256), dtype=jnp.float32)
    y3 = jax.block_until_ready(selector_patch_1d(x3, 8, 200))
    assert y3.shape == (32, 192)
    assert jnp.array_equal(y3, x3[:, 8:200]), "mismatch (unaligned batch)"

    # Case 4: unaligned window, covering block strictly smaller than the row
    # (reads only cols [0, 512) of 1024 -> exercises the reduced-traffic path).
    x4 = jax.random.normal(k4, (16, 1024), dtype=jnp.float32)
    y4 = jax.block_until_ready(selector_patch_1d(x4, 200, 392))
    assert y4.shape == (16, 192)
    assert jnp.array_equal(y4, x4[:, 200:392]), "mismatch (covering window)"

    # Case 5: covering block with a non-zero block index (cols [512, 768)).
    x5 = jax.random.normal(k5, (16, 1024), dtype=jnp.float32)
    y5 = jax.block_until_ready(selector_patch_1d(x5, 600, 700))
    assert y5.shape == (16, 100)
    assert jnp.array_equal(y5, x5[:, 600:700]), "mismatch (covering, q>0)"

    print("KERNEL_OK")
</pallas_src>

<mosaic_0001>
module attributes {stable_mosaic.version = 11 : i64} {
  func.func @_shift_kernel(%arg0: i32, %arg1: memref<2x32xf32, #tpu.memory_space<vmem>>, %arg2: memref<2x16xf32, #tpu.memory_space<vmem>>) attributes {dimension_semantics = [#tpu.dimension_semantics<parallel>], iteration_bounds = array<i64: 1>, scalar_prefetch = 0 : i64, scratch_operands = 0 : i64, tpu.core_type = #tpu.core_type<tc>, window_params = [{transform_indices = @transform_0, window_bounds = array<i64: 2, 32>}, {transform_indices = @transform_1, window_bounds = array<i64: 2, 16>}]} {
    %c0 = arith.constant 0 : index
    %c8 = arith.constant 8 : index
    %0 = vector.load %arg1[%c0, %c8] : memref<2x32xf32, #tpu.memory_space<vmem>>, vector<2x16xf32>
    %c0_0 = arith.constant 0 : index
    %c0_1 = arith.constant 0 : index
    %1 = vector.load %arg2[%c0_0, %c0_1] : memref<2x16xf32, #tpu.memory_space<vmem>>, vector<2x16xf32>
    tpu.vector_store %arg2[%c0_0, %c0_1], %0 {strides = array<i32>} : memref<2x16xf32, #tpu.memory_space<vmem>>, vector<2x16xf32>,
    return
  }
  func.func @transform_0(%arg0: i32) -> (i32, i32) {
    %c0_i32 = arith.constant 0 : i32
    %c0_i32_0 = arith.constant 0 : i32
    return %arg0, %c0_i32 : i32, i32
  }
  func.func @transform_1(%arg0: i32) -> (i32, i32) {
    %c0_i32 = arith.constant 0 : i32
    %c0_i32_0 = arith.constant 0 : i32
    return %arg0, %c0_i32 : i32, i32
  }
}

</mosaic_0001>

<bundles_post_ra>
// kernel: tpu_custom_call.1
= control target key start
LH: loop header
LB: loop body
LE: loop exit
PB: predicated region body
PF: predicated region fallthrough
CT: control target
= control target key end

     0   :  { %6 = vsyncpa [#allocation3], 0  ;;  %s131_s0 = inlined_call_operand.hbm [shape: f32[2,32], index: 0, kind: input, shape index: {}]   ;;  %s132_s1 = inlined_call_operand.hbm [shape: f32[2,16], index: 1, kind: output, shape index: {}]  }
   0x1   :  { %7 = vsyncpa [#allocation4], 0  ;;  %s94_s6 = smov [#allocation2]   ;;  %s46_s10 = scalar_lea.hbm %s131_s0, 32 }
   0x2   :  { %s14_s7 = sshll.u32 %s94_s6, 4  ;;  %p47_p0 = scmp.ne.s32.totalorder %s131_s0, %s46_s10  ;;  %s15_s7 = int_to_ptr.vmem [resolvable:$true] %s14_s7 }
   0x3   :  { %p50_p1 = scmp.lt.u32.totalorder %s46_s10, %s131_s0 }
   0x5   :  { %p52_p2 = pnand %p50_p1, %p47_p0 }
   0x7   :  { %55 = shalt.err (!%p52_p2)
}
   0x8   :  { %s56_s15 = scalar_lea.vmem %s15_s7, 32  ;;  %p61_p4 = scmp.lt.s32.totalorder %s15_s7, %s15_s7 }
   0x9   :  { %p57_p3 = scmp.ne.s32.totalorder %s15_s7, %s56_s15  ;;  %p62_p5 = scmp.lt.s32.totalorder %s56_s15, %s56_s15 }
   0xb   :  { %p63_p6 = por %p62_p5, %p61_p4 }
   0xd   :  { %p64_p7 = pnand %p63_p6, %p57_p3 }
   0xf   :  { %67 = shalt.err (!%p64_p7)
}
  0x10   :  { %17 = dma.hbm_to_vmem [thread:$0]  %s131_s0, 32, %s15_s7, [#allocation3]  }
  0x11   :  { %90 = dma.done.wait [#allocation3], 32  }
  0x12   :  { %91 = vsyncadd [#allocation3], 4294967264  ;;  %v21_v0 = vld [vmem:[#allocation2] sm:$0x3]  ;;  %s95_s18 = smov 120   ;;  %s96_s19 = smov [#allocation5]  }
  0x13   :  { %23 = vrot.lane.b32.xlu0 %v21_v0, %s95_s18  ;;  %s34_s20 = sshll.u32 %s96_s19, 4  ;;  %vm26_vm0 = vcmask 123904   ;;  %s35_s20 = int_to_ptr.vmem [resolvable:$true] %s34_s20 }
  0x14   :  { %s68_s21 = scalar_lea.vmem %s35_s20, 32  ;;  %p73_p9 = scmp.lt.s32.totalorder %s35_s20, %s35_s20 }
  0x15   :  { %p69_p8 = scmp.ne.s32.totalorder %s35_s20, %s68_s21  ;;  %p74_p10 = scmp.lt.s32.totalorder %s68_s21, %s68_s21 }
  0x17   :  { %p75_p11 = por %p74_p10, %p73_p9 }
  0x19   :  { %p76_p12 = pnand %p75_p11, %p69_p8 }
  0x85   :  { %v24_v1 = vpop.permute.xlu0 %23 }
  0x86   :  { %27 = vst.msk [vmem:[#allocation5] sm:$0x3] %vm26_vm0, %v24_v1 }
  0x87   :  { %79 = shalt.err (!%p76_p12)
}
  0x88   :  { %s80_s23 = scalar_lea.hbm %s132_s1, 32 }
  0x89   :  { %p81_p13 = scmp.ne.s32.totalorder %s132_s1, %s80_s23  ;;  %p84_p0 = scmp.lt.u32.totalorder %s80_s23, %s132_s1 }
  0x8b   :  { %p86_p1 = pnand %p84_p0, %p81_p13 }
  0x8d   :  { %89 = shalt.err (!%p86_p1)
}
  0x8e   :  { %37 = dma.vmem_to_hbm [thread:$0]  %s35_s20, 32, %s132_s1, [#allocation4]  }
  0x8f   :  { %92 = dma.done.wait [#allocation4], 32  }
  0x90   :  { %93 = vsyncadd [#allocation4], 4294967264 }
  0x91   :  { %41 = vsyncpa [#allocation3], 1 }
  0x92   :  { %42 = vsyncpa [#allocation4], 1 }

</bundles_post_ra>
